<compile_context>
chip_gen: v6e
topology: v6e:2x2x1
jax: 0.10.0
libtpu: 0.0.40
codegen_flags: <defaults>
</compile_context>

<pallas_src>
import jax
import jax.numpy as jnp
from jax.experimental import pallas as pl
from jax.experimental.pallas import tpu as pltpu


FEAT_PAD = 128   # lane width; hidden feature dims padded to this inside the kernel
IN_PAD = 8       # in_features padded only to the sublane width (4 -> 8)
OUT_PAD = 8      # output columns kept in HBM (3 useful + 5 zero-padded)


def mlp_kernel(x_ref, p_ref, o_ref):
    F = p_ref.shape[1]           # 128
    x = x_ref[...]               # (TB, 8) bf16

    # Static slices into the packed parameter slab (zero runtime cost).
    w1 = p_ref[0:IN_PAD, :]          # (8, 128)  -- only the first 8 rows of slab #1 are useful
    w2 = p_ref[1 * F:2 * F, :]       # (128, 128)
    w3 = p_ref[2 * F:3 * F, :]       # (128, 128)
    b_rows = p_ref[3 * F:3 * F + 8, :]   # (8, 128); rows 0..2 hold the biases
    b1 = b_rows[0:1, :].astype(jnp.float32)
    b2 = b_rows[1:2, :].astype(jnp.float32)
    b3 = b_rows[2:3, :].astype(jnp.float32)

    # fc1 + relu   (bf16 MXU inputs, f32 accumulation, f32 bias/ReLU)
    h = jnp.maximum(jnp.dot(x, w1, preferred_element_type=jnp.float32) + b1, 0.0)
    # fc2 + relu
    h = jnp.maximum(
        jnp.dot(h.astype(jnp.bfloat16), w2, preferred_element_type=jnp.float32) + b2, 0.0)
    # out + relu
    y = jnp.maximum(
        jnp.dot(h.astype(jnp.bfloat16), w3, preferred_element_type=jnp.float32) + b3, 0.0)

    # Store only the narrow (first OUT_PAD) columns; padded columns are exactly zero anyway.
    o_ref[...] = y[:, :o_ref.shape[1]].astype(o_ref.dtype)


def pack_params(w1, b1, w2, b2, w3, b3, F=FEAT_PAD, dtype=jnp.bfloat16):
    """Pack all weights/biases into one zero-padded (3*F + 8, F) bf16 slab."""
    def pad_w(w):
        buf = jnp.zeros((F, F), dtype)
        return buf.at[:w.shape[0], :w.shape[1]].set(w.astype(dtype))

    def pad_b(b):
        b = b.reshape(-1)
        buf = jnp.zeros((F,), dtype)
        return buf.at[:b.shape[0]].set(b.astype(dtype))

    bias_block = jnp.zeros((8, F), dtype)
    bias_block = (bias_block.at[0].set(pad_b(b1))
                            .at[1].set(pad_b(b2))
                            .at[2].set(pad_b(b3)))
    return jnp.concatenate([pad_w(w1), pad_w(w2), pad_w(w3), bias_block], axis=0)


def mlp_forward(x, w1, b1, w2, b2, w3, b3, *, tb_max=4096):
    B, in_f = x.shape
    h1f, h2f = w1.shape[1], w2.shape[1]
    out_features = w3.shape[1]
    F = FEAT_PAD

    # --- batch tiling ---------------------------------------------------------
    B8 = ((B + 7) // 8) * 8
    num_tiles = max(1, -(-B8 // tb_max))
    # Keep >= 2 grid steps when there is enough work so v7x's two TensorCores both
    # get a share of the "parallel" batch axis.
    if num_tiles == 1 and B8 >= 16:
        num_tiles = 2
    TB = ((-(-B8 // num_tiles) + 7) // 8) * 8
    Bp = TB * num_tiles

    # --- narrow, bf16 HBM operands -------------------------------------------
    x_p = jnp.zeros((Bp, IN_PAD), jnp.bfloat16).at[:B, :in_f].set(x.astype(jnp.bfloat16))
    params = pack_params(w1, b1, w2, b2, w3, b3, F)

    flops = 2 * B * (in_f * h1f + h1f * h2f + h2f * out_features)
    bytes_accessed = (x_p.size * 2          # bf16 input actually DMA'd
                      + params.size * 2     # bf16 param slab
                      + Bp * OUT_PAD * 4)   # f32 output actually DMA'd

    out_padded = pl.pallas_call(
        mlp_kernel,
        out_shape=jax.ShapeDtypeStruct((Bp, OUT_PAD), jnp.float32),
        grid=(num_tiles,),
        in_specs=[
            pl.BlockSpec((TB, IN_PAD), lambda i: (i, 0)),      # x: narrow, tiled over batch
            pl.BlockSpec(params.shape, lambda i: (0, 0)),      # params: grid-invariant slab
        ],
        out_specs=pl.BlockSpec((TB, OUT_PAD), lambda i: (i, 0)),  # narrow output
        compiler_params=pltpu.CompilerParams(
            dimension_semantics=("parallel",),
            vmem_limit_bytes=32 * 1024 * 1024,
        ),
        cost_estimate=pl.CostEstimate(
            flops=flops, transcendentals=0, bytes_accessed=bytes_accessed
        ),
    )(x_p, params)

    return out_padded[:B, :out_features]


def init_linear(key, in_f, out_f):
    # Deterministic init mimicking torch.nn.Linear default (uniform +/- 1/sqrt(in_f)).
    kw, kb = jax.random.split(key)
    bound = 1.0 / jnp.sqrt(jnp.float32(in_f))
    # Stored as (in_f, out_f) so the kernel computes x @ W (== x @ W_torch.T).
    w = jax.random.uniform(kw, (in_f, out_f), jnp.float32, -bound, bound)
    b = jax.random.uniform(kb, (1, out_f), jnp.float32, -bound, bound)
    return w, b


if __name__ == "__main__":
    in_feature, h1, h2, output_features = 4, 8, 9, 3
    batch = 8

    key = jax.random.PRNGKey(0)
    kx, k1, k2, k3 = jax.random.split(key, 4)

    x = jax.random.normal(kx, (batch, in_feature), jnp.float32)
    w1, b1 = init_linear(k1, in_feature, h1)
    w2, b2 = init_linear(k2, h1, h2)
    w3, b3 = init_linear(k3, h2, output_features)

    out = mlp_forward(x, w1, b1, w2, b2, w3, b3)
    out = jax.block_until_ready(out)

    # Pure-JAX f32 reference check (kernel runs the matmuls with bf16 inputs,
    # so use a bf16-appropriate tolerance).
    ref = jnp.maximum(x @ w1 + b1, 0.0)
    ref = jnp.maximum(ref @ w2 + b2, 0.0)
    ref = jnp.maximum(ref @ w3 + b3, 0.0)
    assert out.shape == (batch, output_features)
    assert jnp.allclose(out, ref, atol=5e-2, rtol=5e-2)

    print("KERNEL_OK")
</pallas_src>

<mosaic_0001>
module attributes {stable_mosaic.version = 11 : i64} {
  func.func @mlp_kernel(%arg0: i32, %arg1: memref<8x8xbf16, #tpu.memory_space<vmem>>, %arg2: memref<392x128xbf16, #tpu.memory_space<vmem>>, %arg3: memref<8x8xf32, #tpu.memory_space<vmem>>) attributes {dimension_semantics = [#tpu.dimension_semantics<parallel>], iteration_bounds = array<i64: 1>, scalar_prefetch = 0 : i64, scratch_operands = 0 : i64, tpu.core_type = #tpu.core_type<tc>, window_params = [{transform_indices = @transform_0, window_bounds = array<i64: 8, 8>}, {pipeline_mode = #tpu.pipeline_mode<synchronous>, transform_indices = @transform_1, window_bounds = array<i64: 392, 128>}, {transform_indices = @transform_2, window_bounds = array<i64: 8, 8>}]} {
    %c0 = arith.constant 0 : index
    %c0_0 = arith.constant 0 : index
    %0 = vector.load %arg1[%c0, %c0_0] : memref<8x8xbf16, #tpu.memory_space<vmem>>, vector<8x8xbf16>
    %c0_1 = arith.constant 0 : index
    %c0_2 = arith.constant 0 : index
    %1 = vector.load %arg2[%c0_1, %c0_2] : memref<392x128xbf16, #tpu.memory_space<vmem>>, vector<8x128xbf16>
    %c128 = arith.constant 128 : index
    %c0_3 = arith.constant 0 : index
    %2 = vector.load %arg2[%c128, %c0_3] : memref<392x128xbf16, #tpu.memory_space<vmem>>, vector<128x128xbf16>
    %c256 = arith.constant 256 : index
    %c0_4 = arith.constant 0 : index
    %3 = vector.load %arg2[%c256, %c0_4] : memref<392x128xbf16, #tpu.memory_space<vmem>>, vector<128x128xbf16>
    %c384 = arith.constant 384 : index
    %c0_5 = arith.constant 0 : index
    %4 = vector.load %arg2[%c384, %c0_5] : memref<392x128xbf16, #tpu.memory_space<vmem>>, vector<8x128xbf16>
    %5 = vector.extract_strided_slice %4 {offsets = [0, 0], sizes = [1, 128], strides = [1, 1]} : vector<8x128xbf16> to vector<1x128xbf16>
    %6 = arith.extf %5 : vector<1x128xbf16> to vector<1x128xf32>
    %7 = vector.extract_strided_slice %4 {offsets = [1, 0], sizes = [1, 128], strides = [1, 1]} : vector<8x128xbf16> to vector<1x128xbf16>
    %8 = arith.extf %7 : vector<1x128xbf16> to vector<1x128xf32>
    %9 = vector.extract_strided_slice %4 {offsets = [2, 0], sizes = [1, 128], strides = [1, 1]} : vector<8x128xbf16> to vector<1x128xbf16>
    %10 = arith.extf %9 : vector<1x128xbf16> to vector<1x128xf32>
    %cst = arith.constant dense<0.000000e+00> : vector<8x128xf32>
    %11 = tpu.matmul %0, %1, %cst {dimension_numbers = #tpu.dot_dimension_numbers<[1], [0], [0], [1], [0, 0, 1, 1], [], []>} : vector<8x8xbf16>, vector<8x128xbf16>, vector<8x128xf32> -> vector<8x128xf32>
    %12 = vector.broadcast %6 : vector<1x128xf32> to vector<8x128xf32>
    %13 = arith.addf %11, %12 : vector<8x128xf32>
    %cst_6 = arith.constant 0.000000e+00 : f32
    %14 = vector.broadcast %cst_6 : f32 to vector<8x128xf32>
    %15 = arith.maximumf %13, %14 : vector<8x128xf32>
    %16 = arith.truncf %15 : vector<8x128xf32> to vector<8x128xbf16>
    %cst_7 = arith.constant dense<0.000000e+00> : vector<8x128xf32>
    %17 = tpu.matmul %16, %2, %cst_7 {dimension_numbers = #tpu.dot_dimension_numbers<[1], [0], [0], [1], [0, 0, 1, 1], [], []>} : vector<8x128xbf16>, vector<128x128xbf16>, vector<8x128xf32> -> vector<8x128xf32>
    %18 = vector.broadcast %8 : vector<1x128xf32> to vector<8x128xf32>
    %19 = arith.addf %17, %18 : vector<8x128xf32>
    %cst_8 = arith.constant 0.000000e+00 : f32
    %20 = vector.broadcast %cst_8 : f32 to vector<8x128xf32>
    %21 = arith.maximumf %19, %20 : vector<8x128xf32>
    %22 = arith.truncf %21 : vector<8x128xf32> to vector<8x128xbf16>
    %cst_9 = arith.constant dense<0.000000e+00> : vector<8x128xf32>
    %23 = tpu.matmul %22, %3, %cst_9 {dimension_numbers = #tpu.dot_dimension_numbers<[1], [0], [0], [1], [0, 0, 1, 1], [], []>} : vector<8x128xbf16>, vector<128x128xbf16>, vector<8x128xf32> -> vector<8x128xf32>
    %24 = vector.broadcast %10 : vector<1x128xf32> to vector<8x128xf32>
    %25 = arith.addf %23, %24 : vector<8x128xf32>
    %cst_10 = arith.constant 0.000000e+00 : f32
    %26 = vector.broadcast %cst_10 : f32 to vector<8x128xf32>
    %27 = arith.maximumf %25, %26 : vector<8x128xf32>
    %28 = vector.extract_strided_slice %27 {offsets = [0, 0], sizes = [8, 8], strides = [1, 1]} : vector<8x128xf32> to vector<8x8xf32>
    %c0_11 = arith.constant 0 : index
    %c0_12 = arith.constant 0 : index
    %29 = vector.load %arg3[%c0_11, %c0_12] : memref<8x8xf32, #tpu.memory_space<vmem>>, vector<8x8xf32>
    tpu.vector_store %arg3[%c0_11, %c0_12], %28 {strides = array<i32>} : memref<8x8xf32, #tpu.memory_space<vmem>>, vector<8x8xf32>,
    return
  }
  func.func @transform_0(%arg0: i32) -> (i32, i32) {
    %c0_i32 = arith.constant 0 : i32
    %c0_i32_0 = arith.constant 0 : i32
    return %arg0, %c0_i32 : i32, i32
  }
  func.func @transform_1(%arg0: i32) -> (i32, i32) {
    %c0_i32 = arith.constant 0 : i32
    %c0_i32_0 = arith.constant 0 : i32
    %c0_i32_1 = arith.constant 0 : i32
    return %c0_i32, %c0_i32_0 : i32, i32
  }
  func.func @transform_2(%arg0: i32) -> (i32, i32) {
    %c0_i32 = arith.constant 0 : i32
    %c0_i32_0 = arith.constant 0 : i32
    return %arg0, %c0_i32 : i32, i32
  }
}

</mosaic_0001>

<bundles_post_ra>
// kernel: tpu_custom_call.1
= control target key start
LH: loop header
LB: loop body
LE: loop exit
PB: predicated region body
PF: predicated region fallthrough
CT: control target
= control target key end

     0   :  { %7 = vsyncpa [#allocation3], 0  ;;  %s561_s0 = inlined_call_operand.hbm [shape: bf16[8,8], index: 0, kind: input, shape index: {}]   ;;  %s562_s1 = inlined_call_operand.hbm [shape: bf16[392,128], index: 1, kind: input, shape index: {}]   ;;  %s563_s2 = inlined_call_operand.hbm [shape: f32[8,8], index: 2, kind: output, shape index: {}]  }
   0x1   :  { %8 = vsyncpa [#allocation6], 0 }
   0x2   :  { %9 = vsyncpa [#allocation4], 0  ;;  %s505_s9 = smov [#allocation2]   ;;  %s506_s11 = smov [#allocation5]  }
   0x3   :  { %s16_s10 = sshll.u32 %s505_s9, 4  ;;  %s25_s12 = sshll.u32 %s506_s11, 4  ;;  %s17_s10 = int_to_ptr.vmem [resolvable:$true] %s16_s10  ;;  %s26_s12 = int_to_ptr.vmem [resolvable:$true] %s25_s12 }
   0x4   :  { %s447_s13 = scalar_lea.vmem %s17_s10, 64  ;;  %p452_p1 = scmp.lt.s32.totalorder %s17_s10, %s17_s10 }
   0x5   :  { %p448_p0 = scmp.ne.s32.totalorder %s17_s10, %s447_s13  ;;  %p453_p2 = scmp.lt.s32.totalorder %s447_s13, %s447_s13 }
   0x7   :  { %p454_p3 = por %p453_p2, %p452_p1 }
   0x9   :  { %p455_p4 = pnand %p454_p3, %p448_p0 }
   0xb   :  { %458 = shalt.err (!%p455_p4)
}
   0xc   :  { %19 = dma.hbm_to_vmem [thread:$0]  %s561_s0, 64, %s17_s10, [#allocation3]  }
   0xd   :  { %s467_s16 = scalar_lea.vmem %s26_s12, 3136  ;;  %p472_p6 = scmp.lt.s32.totalorder %s26_s12, %s26_s12 }
   0xe   :  { %p468_p5 = scmp.ne.s32.totalorder %s26_s12, %s467_s16  ;;  %p473_p7 = scmp.lt.s32.totalorder %s467_s16, %s467_s16 }
  0x10   :  { %p474_p8 = por %p473_p7, %p472_p6 }
  0x12   :  { %p475_p9 = pnand %p474_p8, %p468_p5 }
  0x14   :  { %478 = shalt.err (!%p475_p9)
}
  0x15   :  { %s507_s17 = smov 64   ;;  %s508_s18 = smov 4  }
  0x16   :  { %31 = dma.hbm_to_vmem [thread:$0]  %s562_s1, 3136, %s26_s12, [#allocation6], %s507_s17, %s507_s17, %s508_s18  }
  0x17   :  { %499 = dma.done.wait [#allocation3], 64  }
  0x18   :  { %500 = vsyncadd [#allocation3], 4294967232 }
  0x19   :  { %501 = dma.done.wait [#allocation6], 3136  }
  0x1a   :  { %502 = vsyncadd [#allocation6], 4294964160  ;;  %v509_v0 = vmov 0.0   ;;  %vm510_vm0 = vmmov 0   ;;  %vm83_vm1 = vcmask 1043456   ;;  %vm79_vm2 = vcmask 64512  }
  0x1b   :  { %370 = vmatprep.subr.bf16.mxu0 %v509_v0  ;;  %372 = vmatprep.mubr.msk.bf16.mxu0 %vm510_vm0, %v509_v0  ;;  %v40_v1 = vld [vmem:[#allocation5] sm:$0xf]  ;;  %v423_v3 = vld [vmem:[#allocation5 + $0x78] sm:$0xff]   ;;  %v424_v5 = vld [vmem:[#allocation5 + $0x70] sm:$0xff]   ;;  %v75_v18 = vlaneseq  ;;  %s511_s0 = smov [#allocation7]  }
  0x1c   :  { %376 = vmatprep.subr.bf16.mxu1 %v509_v0  ;;  %392 = vmatprep.mubr.msk.bf16.mxu1 %vm510_vm0, %v509_v0  ;;  %v85_v2 = vsel %vm83_vm1, %v40_v1, 0  ;;  %v39_v4 = vld [vmem:[#allocation2] sm:$0xf]  ;;  %v425_v6 = vld [vmem:[#allocation5 + $0x68] sm:$0xff]   ;;  %v426_v7 = vld [vmem:[#allocation5 + $0x60] sm:$0xff]   ;;  %s323_s1 = sshll.u32 %s511_s0, 4  ;;  %s324_s1 = int_to_ptr.vmem [resolvable:$true] %s323_s1 }
  0x1d   :  { %371 = vmatpush3.bf16.msra.mxu0 %v85_v2  ;;  %377 = vmatpush3.bf16.msra.mxu1 %v423_v3  ;;  %v427_v8 = vld [vmem:[#allocation5 + $0x58] sm:$0xff]   ;;  %v428_v9 = vld [vmem:[#allocation5 + $0x50] sm:$0xff]   ;;  %v429_v10 = vld [vmem:[#allocation5 + $0x48] sm:$0xff]   ;;  %v76_v19 = vshrl.u32 %v75_v18, 7  ;;  %s479_s21 = scalar_lea.vmem %s324_s1, 128  ;;  %p484_p11 = scmp.lt.s32.totalorder %s324_s1, %s324_s1 }
  0x1e   :  { %396 = vmatprep.subr.bf16.mxu0 %v509_v0  ;;  %378 = vmatprep.subr.bf16.mxu1 %v509_v0  ;;  %v430_v11 = vld [vmem:[#allocation5 + $0x40] sm:$0xff]   ;;  %v431_v12 = vld [vmem:[#allocation5 + $0xb8] sm:$0xff]   ;;  %v432_v13 = vld [vmem:[#allocation5 + $0xb0] sm:$0xff]   ;;  %p480_p10 = scmp.ne.s32.totalorder %s324_s1, %s479_s21  ;;  %p485_p12 = scmp.lt.s32.totalorder %s479_s21, %s479_s21 }
  0x1f   :  { %v433_v14 = vld [vmem:[#allocation5 + $0xa8] sm:$0xff]   ;;  %v434_v15 = vld [vmem:[#allocation5 + $0xa0] sm:$0xff]   ;;  %v435_v16 = vld [vmem:[#allocation5 + $0x98] sm:$0xff]   ;;  %v77_v22 = vsub.s32 0, %v76_v19  ;;  %v131_v33 = vsub.s32 1, %v76_v19  ;;  %v225_v42 = vsub.s32 2, %v76_v19 }
  0x20   :  { %373 = vmatmul.mubr.msk.bf16.vlgmr.msra.gmra.mxu0 %vm79_vm2, %v39_v4  ;;  %v436_v17 = vld [vmem:[#allocation5 + $0x90] sm:$0xff]   ;;  %v73_v20 = vld [vmem:[#allocation5 + $0xc0] sm:$0xf]  ;;  %v437_v31 = vld [vmem:[#allocation5 + $0x88] sm:$0xff]   ;;  %p486_p13 = por %p485_p12, %p484_p11 }
  0x21   :  { %412 = vmatprep.mubr.msk.bf16.mxu0 %vm510_vm0, %v509_v0  ;;  %379 = vmatpush3.bf16.msra.mxu1 %v424_v5  ;;  %v74_v21 = vunpack.c.l.bf16 %v73_v20  ;;  %v438_v32 = vld [vmem:[#allocation5 + $0x80] sm:$0xff]  }
  0x22   :  { %380 = vmatprep.subr.bf16.mxu1 %v509_v0  ;;  %397 = vmatpush3.bf16.msra.mxu0 %v431_v12  ;;  %p487_p0 = pnand %p486_p13, %p480_p10 }
  0x23   :  { %398 = vmatprep.subr.bf16.mxu0 %v509_v0  ;;  %v78_v23 = vrot.slane %v74_v21, %v77_v22  ;;  %v132_v34 = vrot.slane %v74_v21, %v131_v33  ;;  %v226_v43 = vrot.slane %v74_v21, %v225_v42 }
  0x25   :  { %381 = vmatpush3.bf16.msra.mxu1 %v425_v6 }
  0x26   :  { %382 = vmatprep.subr.bf16.mxu1 %v509_v0  ;;  %399 = vmatpush3.bf16.msra.mxu0 %v432_v13 }
  0x27   :  { %400 = vmatprep.subr.bf16.mxu0 %v509_v0 }
  0x29   :  { %383 = vmatpush3.bf16.msra.mxu1 %v426_v7 }
  0x2a   :  { %384 = vmatprep.subr.bf16.mxu1 %v509_v0  ;;  %401 = vmatpush3.bf16.msra.mxu0 %v433_v14 }
  0x2b   :  { %402 = vmatprep.subr.bf16.mxu0 %v509_v0 }
  0x2d   :  { %385 = vmatpush3.bf16.msra.mxu1 %v427_v8 }
  0x2e   :  { %386 = vmatprep.subr.bf16.mxu1 %v509_v0  ;;  %403 = vmatpush3.bf16.msra.mxu0 %v434_v15 }
  0x2f   :  { %404 = vmatprep.subr.bf16.mxu0 %v509_v0 }
  0x31   :  { %387 = vmatpush3.bf16.msra.mxu1 %v428_v9 }
  0x32   :  { %388 = vmatprep.subr.bf16.mxu1 %v509_v0  ;;  %405 = vmatpush3.bf16.msra.mxu0 %v435_v16 }
  0x33   :  { %406 = vmatprep.subr.bf16.mxu0 %v509_v0 }
  0x35   :  { %389 = vmatpush3.bf16.msra.mxu1 %v429_v10 }
  0x36   :  { %390 = vmatprep.subr.bf16.mxu1 %v509_v0  ;;  %407 = vmatpush3.bf16.msra.mxu0 %v436_v17 }
  0x37   :  { %408 = vmatprep.subr.bf16.mxu0 %v509_v0 }
  0x39   :  { %391 = vmatpush3.bf16.msra.mxu1 %v430_v11 }
  0x3a   :  { %409 = vmatpush3.bf16.msra.mxu0 %v437_v31 }
  0x3b   :  { %410 = vmatprep.subr.bf16.mxu0 %v509_v0 }
  0x3e   :  { %411 = vmatpush3.bf16.msra.mxu0 %v438_v32 }
  0xe0   :  { %v121_v24 = vpop.f32.mrf.mxu0 }
  0xe1   :  { %v122_v25 = vadd.f32 %v121_v24, %v78_v23 }
  0xe2   :  { %v374_v26 = vpop.f32.mrf.mxu0 }
  0xe3   :  { %v127_v27 = vmax.f32 %v122_v25, 0.0 }
  0xe4   :  { %v124_v28 = vpop.f32.mrf.mxu0 }
  0xe5   :  { %v128_v29 = vpack.c.bf16 %v127_v27, %v127_v27 }
  0xe6   :  { %v375_v30 = vpop.f32.mrf.mxu0 }
  0xe7   :  { %393 = vmatmul.mubr.bf16.vlgmr.msra.gmra.mxu1 %v128_v29 }
 0x1a7   :  { %v215_v35 = vpop.f32.mrf.mxu1 }
 0x1a8   :  { %v216_v36 = vadd.f32 %v215_v35, %v132_v34 }
 0x1a9   :  { %v394_v37 = vpop.f32.mrf.mxu1 }
 0x1aa   :  { %v221_v38 = vmax.f32 %v216_v36, 0.0 }
 0x1ab   :  { %v218_v39 = vpop.f32.mrf.mxu1 }
 0x1ac   :  { %v222_v40 = vpack.c.bf16 %v221_v38, %v221_v38 }
 0x1ad   :  { %v395_v41 = vpop.f32.mrf.mxu1 }
 0x1ae   :  { %413 = vmatmul.mubr.bf16.vlgmr.msra.gmra.mxu0 %v222_v40 }
 0x26e   :  { %v309_v44 = vpop.f32.mrf.mxu0 }
 0x26f   :  { %v310_v45 = vadd.f32 %v309_v44, %v226_v43 }
 0x270   :  { %v414_v46 = vpop.f32.mrf.mxu0 }
 0x271   :  { %v315_v47 = vmax.f32 %v310_v45, 0.0 }
 0x272   :  { %v312_v48 = vpop.f32.mrf.mxu0 }
 0x273   :  { %316 = vst.msk [vmem:[#allocation7] sm:$0xff] %vm79_vm2, %v315_v47 }
 0x274   :  { %v415_v49 = vpop.f32.mrf.mxu0 }
 0x275   :  { %490 = shalt.err (!%p487_p0)
}
 0x276   :  { %326 = dma.vmem_to_hbm [thread:$0]  %s324_s1, 128, %s563_s2, [#allocation4]  }
 0x277   :  { %503 = dma.done.wait [#allocation4], 128  }
 0x278   :  { %504 = vsyncadd [#allocation4], 4294967168 }
 0x279   :  { %330 = vsyncpa [#allocation3], 1 }
 0x27a   :  { %331 = vsyncpa [#allocation6], 1 }
 0x27b   :  { %332 = vsyncpa [#allocation4], 1 }

</bundles_post_ra>
